<compile_context>
chip_gen: v6e
topology: v6e:2x2x1
jax: 0.10.0
libtpu: 0.0.40
codegen_flags: <defaults>
</compile_context>

<pallas_src>
import functools

import jax
import jax.numpy as jnp
from jax.experimental import pallas as pl
from jax.experimental.pallas import tpu as pltpu


def _round_up(x, m):
    return ((x + m - 1) // m) * m


# --------------------------------------------------------------------------------------
# Pallas kernels
# --------------------------------------------------------------------------------------
def _matmul_bias_act_kernel(a_ref, b_ref, bias_ref, o_ref, acc_ref, *, activation):
    """Tiled matmul with f32 accumulator; bias + optional ReLU epilogue on the last K step."""
    @pl.when(pl.program_id(2) == 0)
    def _():
        acc_ref[...] = jnp.zeros_like(acc_ref)

    acc_ref[...] += jnp.dot(a_ref[...], b_ref[...], preferred_element_type=jnp.float32)

    @pl.when(pl.program_id(2) == pl.num_programs(2) - 1)
    def _():
        acc = acc_ref[...] + bias_ref[...]          # (1, tn) broadcast over rows
        if activation == "relu":
            acc = jnp.maximum(acc, 0.0)
        o_ref[...] = acc.astype(o_ref.dtype)


def _memory_kernel(z_ref, mem_ref, zhat_ref, att_ref, *, shrink_thres):
    """Memory addressing on one row tile: softmax attention, hard shrinkage, re-read."""
    z = z_ref[...]                                   # (tm, C) bf16
    mem = mem_ref[...]                               # (S,  C) bf16 (resident across the grid)

    # logits = z @ mem^T, contraction over C, f32 accumulation (no explicit transpose).
    logits = jax.lax.dot_general(
        z, mem, (((1,), (1,)), ((), ())), preferred_element_type=jnp.float32)  # (tm, S)

    logits = logits - jnp.max(logits, axis=1, keepdims=True)
    e = jnp.exp(logits)
    att = e * pl.reciprocal(jnp.sum(e, axis=1, keepdims=True), approx=True)

    if shrink_thres > 0.0:
        # hard_shrink_relu: relu(x - lambd) * x / (|x - lambd| + eps), then L1-renormalize.
        shifted = att - shrink_thres
        att = (jnp.maximum(shifted, 0.0) * att) * pl.reciprocal(
            jnp.abs(shifted) + 1e-12, approx=True)
        att = att * pl.reciprocal(
            jnp.maximum(jnp.sum(jnp.abs(att), axis=1, keepdims=True), 1e-12), approx=True)

    zhat_ref[...] = jnp.dot(
        att.astype(jnp.bfloat16), mem, preferred_element_type=jnp.float32
    ).astype(zhat_ref.dtype)
    att_ref[...] = att.astype(att_ref.dtype)         # bf16 writeback (entropy-loss only)


# --------------------------------------------------------------------------------------
# Pallas wrappers
# --------------------------------------------------------------------------------------
def pallas_matmul(a, b, bias, activation="none"):
    """(M,K) @ (K,N) + bias[N], optional ReLU.

    bf16 operands / f32 accumulation, tiled grid (M/tm, N/tn, K/tk) with
    dimension_semantics=("parallel","parallel","arbitrary").  Small K is kept as a single
    full-extent block (no zero-column padding)."""
    M, K = a.shape
    _, N = b.shape

    a = a.astype(jnp.bfloat16)
    b = b.astype(jnp.bfloat16)
    bias = bias.astype(jnp.float32).reshape(1, N)

    tm = min(512, _round_up(M, 16))                  # bf16 sublane-friendly
    Mp = _round_up(M, tm)
    Np = _round_up(N, 128)
    tn = min(256, Np)
    if K <= 1024:
        Kp, tk = K, K                                # single full-extent K block
    else:
        tk = 512
        Kp = _round_up(K, tk)

    if Mp != M or Kp != K:
        a = jnp.pad(a, ((0, Mp - M), (0, Kp - K)))
    if Kp != K or Np != N:
        b = jnp.pad(b, ((0, Kp - K), (0, Np - N)))
    if Np != N:
        bias = jnp.pad(bias, ((0, 0), (0, Np - N)))

    grid = (Mp // tm, Np // tn, Kp // tk)

    out = pl.pallas_call(
        functools.partial(_matmul_bias_act_kernel, activation=activation),
        grid=grid,
        in_specs=[
            pl.BlockSpec((tm, tk), lambda i, j, k: (i, k)),
            pl.BlockSpec((tk, tn), lambda i, j, k: (k, j)),   # weight block independent of i
            pl.BlockSpec((1, tn), lambda i, j, k: (0, j)),
        ],
        out_specs=pl.BlockSpec((tm, tn), lambda i, j, k: (i, j)),
        out_shape=jax.ShapeDtypeStruct((Mp, Np), jnp.float32),
        scratch_shapes=[pltpu.VMEM((tm, tn), jnp.float32)],
        compiler_params=pltpu.CompilerParams(
            dimension_semantics=("parallel", "parallel", "arbitrary"),
            vmem_limit_bytes=32 * 1024 * 1024,
        ),
    )(a, b, bias)

    if Mp != M or Np != N:
        out = out[:M, :N]
    return out


def memory_module(x_nhwc, mem_weight, shrink_thres):
    """Memory addressing + re-read.  Returns (x_hat NHWC f32, att (B, S, H, W) f32)."""
    B, H, W, C = x_nhwc.shape
    S = mem_weight.shape[0]
    M = B * H * W

    tm = min(1024, _round_up(M, 16))
    Mp = _round_up(M, tm)

    z = x_nhwc.reshape(M, C).astype(jnp.bfloat16)
    if Mp != M:
        z = jnp.pad(z, ((0, Mp - M), (0, 0)))
    mem = mem_weight.astype(jnp.bfloat16)

    zhat, att = pl.pallas_call(
        functools.partial(_memory_kernel, shrink_thres=float(shrink_thres)),
        grid=(Mp // tm,),
        in_specs=[
            pl.BlockSpec((tm, C), lambda i: (i, 0)),
            pl.BlockSpec((S, C), lambda i: (0, 0)),          # memory weights stay resident
        ],
        out_specs=(
            pl.BlockSpec((tm, C), lambda i: (i, 0)),
            pl.BlockSpec((tm, S), lambda i: (i, 0)),
        ),
        out_shape=(
            jax.ShapeDtypeStruct((Mp, C), jnp.float32),
            jax.ShapeDtypeStruct((Mp, S), jnp.bfloat16),     # slim attention writeback
        ),
        compiler_params=pltpu.CompilerParams(
            dimension_semantics=("parallel",),
            vmem_limit_bytes=32 * 1024 * 1024,
        ),
    )(z, mem)

    x_hat = zhat[:M].reshape(B, H, W, C)
    att = att[:M].astype(jnp.float32).reshape(B, H, W, S).transpose(0, 3, 1, 2)  # (B, S, H, W)
    return x_hat, att


def conv2d(x_nhwc, w, b, stride=1, activation="relu"):
    """3x3 'same' conv via im2col (JAX glue) + tiled Pallas matmul.  w: (kh, kw, cin, cout)."""
    N, H, W, C = x_nhwc.shape
    kh, kw, cin, cout = w.shape
    ph, pw = kh // 2, kw // 2
    x = x_nhwc.astype(jnp.bfloat16)                  # halve im2col HBM traffic
    x_pad = jnp.pad(x, ((0, 0), (ph, ph), (pw, pw), (0, 0)))
    Ho = (H + 2 * ph - kh) // stride + 1
    Wo = (W + 2 * pw - kw) // stride + 1

    # TODO(synk): fuse the kh*kw tap reduction into the matmul grid (per-tap index_map offsets
    #             into the padded NHWC input) to avoid materializing the 9x im2col patches in HBM.
    patches = []
    for i in range(kh):
        for j in range(kw):
            patches.append(
                x_pad[:, i:i + stride * (Ho - 1) + 1:stride, j:j + stride * (Wo - 1) + 1:stride, :]
            )
    patches = jnp.concatenate(patches, axis=-1)                  # (N, Ho, Wo, kh*kw*cin)
    a = patches.reshape(N * Ho * Wo, kh * kw * cin)
    wmat = w.reshape(kh * kw * cin, cout)
    out = pallas_matmul(a, wmat, b, activation)
    return out.reshape(N, Ho, Wo, cout)


def upsample2(x_nhwc):
    return jnp.repeat(jnp.repeat(x_nhwc, 2, axis=1), 2, axis=2)


# --------------------------------------------------------------------------------------
# Parameter construction (deterministic, in-script)
# --------------------------------------------------------------------------------------
def _conv_init(key, cin, cout, k=3):
    fan_in = k * k * cin
    w = jax.random.normal(key, (k, k, cin, cout), jnp.float32) * (2.0 / fan_in) ** 0.5
    b = jnp.zeros((cout,), jnp.float32)
    return w, b


def init_params(key, features_root, num_slots, num_hist, num_pred):
    fr = features_root
    keys = iter(jax.random.split(key, 32))

    memae = dict(
        enc1=_conv_init(next(keys), 2, fr),
        enc2=_conv_init(next(keys), fr, 2 * fr),
        enc3=_conv_init(next(keys), 2 * fr, 4 * fr),
        mem3=jax.random.normal(next(keys), (num_slots, 4 * fr), jnp.float32) / (4 * fr) ** 0.5,
        mem2=jax.random.normal(next(keys), (num_slots, 2 * fr), jnp.float32) / (2 * fr) ** 0.5,
        mem1=jax.random.normal(next(keys), (num_slots, fr), jnp.float32) / fr ** 0.5,
        dec2=_conv_init(next(keys), 4 * fr, 2 * fr),
        dec2_skip=_conv_init(next(keys), 4 * fr, 2 * fr),
        dec1=_conv_init(next(keys), 2 * fr, fr),
        dec1_skip=_conv_init(next(keys), 2 * fr, fr),
        out=_conv_init(next(keys), fr, 2),
    )

    vunet_in_ch = 3 * num_hist + 2 * num_hist
    vunet = dict(
        enc1=_conv_init(next(keys), vunet_in_ch, fr),
        enc2=_conv_init(next(keys), fr, 2 * fr),
        enc3=_conv_init(next(keys), 2 * fr, 4 * fr),
        dec2=_conv_init(next(keys), 4 * fr, 2 * fr),
        dec2_skip=_conv_init(next(keys), 4 * fr, 2 * fr),
        dec1=_conv_init(next(keys), 2 * fr, fr),
        dec1_skip=_conv_init(next(keys), 2 * fr, fr),
        out=_conv_init(next(keys), fr, 3 * num_pred),
    )
    return dict(memae=memae, vunet=vunet)


# --------------------------------------------------------------------------------------
# Submodule forwards
# --------------------------------------------------------------------------------------
def memae_forward(p, of_slices_nchw, shrink_thres):
    """ML-MemAE on (B*num_hist, 2, H, W) optical-flow slices (num_hist folded into batch)."""
    x = jnp.transpose(of_slices_nchw, (0, 2, 3, 1))              # NHWC
    x1 = conv2d(x, *p["enc1"], stride=1, activation="relu")      # (B', H,   W,   fr)
    x2 = conv2d(x1, *p["enc2"], stride=2, activation="relu")     # (B', H/2, W/2, 2fr)
    x3 = conv2d(x2, *p["enc3"], stride=2, activation="relu")     # (B', H/4, W/4, 4fr)

    x3_hat, att3 = memory_module(x3, p["mem3"], shrink_thres)
    x2_hat, att2 = memory_module(x2, p["mem2"], shrink_thres)
    x1_hat, att1 = memory_module(x1, p["mem1"], shrink_thres)

    u2 = conv2d(upsample2(x3_hat), *p["dec2"], stride=1, activation="relu")
    u2 = conv2d(jnp.concatenate([u2, x2_hat], axis=-1), *p["dec2_skip"], stride=1, activation="relu")
    u1 = conv2d(upsample2(u2), *p["dec1"], stride=1, activation="relu")
    u1 = conv2d(jnp.concatenate([u1, x1_hat], axis=-1), *p["dec1_skip"], stride=1, activation="relu")
    recon = conv2d(u1, *p["out"], stride=1, activation="none")   # (B', H, W, 2)

    return dict(
        recon=jnp.transpose(recon, (0, 3, 1, 2)),
        att_weight3=att3, att_weight2=att2, att_weight1=att1,
    )


def vunet_forward(p, frame_in_nchw, of_recon_nchw):
    app = jnp.transpose(frame_in_nchw, (0, 2, 3, 1))
    mot = jnp.transpose(of_recon_nchw, (0, 2, 3, 1))
    x = jnp.concatenate([app, mot], axis=-1)
    e1 = conv2d(x, *p["enc1"], stride=1, activation="relu")
    e2 = conv2d(e1, *p["enc2"], stride=2, activation="relu")
    e3 = conv2d(e2, *p["enc3"], stride=2, activation="relu")
    d2 = conv2d(upsample2(e3), *p["dec2"], stride=1, activation="relu")
    d2 = conv2d(jnp.concatenate([d2, e2], axis=-1), *p["dec2_skip"], stride=1, activation="relu")
    d1 = conv2d(upsample2(d2), *p["dec1"], stride=1, activation="relu")
    d1 = conv2d(jnp.concatenate([d1, e1], axis=-1), *p["dec1_skip"], stride=1, activation="relu")
    pred = conv2d(d1, *p["out"], stride=1, activation="none")
    saved_tensors = dict(vunet_bottleneck=jnp.transpose(e3, (0, 3, 1, 2)))
    return jnp.transpose(pred, (0, 3, 1, 2)), saved_tensors


def _reorder_att(att, B, num_hist):
    """(B*num_hist, S, h, w) batch-major -> (num_hist*B, S, h, w) hist-major (= torch.cat over j)."""
    BH, S, h, w = att.shape
    return att.reshape(B, num_hist, S, h, w).transpose(1, 0, 2, 3, 4).reshape(BH, S, h, w)


# --------------------------------------------------------------------------------------
# NMR_AFP forward
# --------------------------------------------------------------------------------------
def nmr_afp_forward(params, sample_frame, sample_of, *, num_hist, num_pred,
                    shrink_thres, finetune=False, mode="train"):
    x_ch, y_ch = 3, 2
    B = sample_of.shape[0]
    H, W = sample_of.shape[2], sample_of.shape[3]

    # Fold the num_hist loop into the batch: (B, 2*num_hist, H, W) -> (B*num_hist, 2, H, W).
    of_batched = sample_of.reshape(B, num_hist, y_ch, H, W).reshape(B * num_hist, y_ch, H, W)
    memae_out = memae_forward(params["memae"], of_batched, shrink_thres)

    of_recon = memae_out["recon"].reshape(B, num_hist * y_ch, H, W)   # (B, 2*num_hist, H, W)
    att_weight3 = _reorder_att(memae_out["att_weight3"], B, num_hist)
    att_weight2 = _reorder_att(memae_out["att_weight2"], B, num_hist)
    att_weight1 = _reorder_att(memae_out["att_weight1"], B, num_hist)

    out = {}
    if finetune:
        loss_recon = jnp.mean((of_recon - sample_of) ** 2)
        ent = lambda a: jnp.mean(jnp.sum(-a * jnp.log(a + 1e-12), axis=1))
        loss_sparsity = ent(att_weight3) + ent(att_weight2) + ent(att_weight1)
        out.update(dict(loss_recon=loss_recon, loss_sparsity=loss_sparsity))

    frame_in = sample_frame[:, : -x_ch * num_pred, :, :]
    frame_target = sample_frame[:, -x_ch * num_pred:, :, :]
    frame_pred, saved_tensors = vunet_forward(params["vunet"], frame_in, of_recon)

    out.update(dict(frame_pred=frame_pred, frame_target=frame_target,
                    of_recon=of_recon, of_target=sample_of))
    out.update(saved_tensors)
    return out


# --------------------------------------------------------------------------------------
if __name__ == "__main__":
    B, H, W = 2, 16, 16
    num_hist, num_pred = 4, 1
    features_root, num_slots = 8, 16
    shrink_thres = 0.0025

    key = jax.random.PRNGKey(0)
    k_frame, k_of, k_param = jax.random.split(key, 3)
    sample_frame = jax.random.normal(k_frame, (B, 3 * (num_hist + num_pred), H, W), jnp.float32)
    sample_of = jax.random.normal(k_of, (B, 2 * num_hist, H, W), jnp.float32)

    params = init_params(k_param, features_root, num_slots, num_hist, num_pred)

    out = nmr_afp_forward(params, sample_frame, sample_of,
                          num_hist=num_hist, num_pred=num_pred,
                          shrink_thres=shrink_thres, finetune=False, mode="train")
    jax.block_until_ready(out)

    assert out["frame_pred"].shape == (B, 3 * num_pred, H, W)
    assert out["frame_target"].shape == (B, 3 * num_pred, H, W)
    assert out["of_recon"].shape == sample_of.shape
    assert out["of_target"].shape == sample_of.shape
    assert bool(jnp.all(jnp.isfinite(out["frame_pred"]))) and bool(jnp.all(jnp.isfinite(out["of_recon"])))
    print("KERNEL_OK")
</pallas_src>

<mosaic_0001>
module attributes {stable_mosaic.version = 11 : i64} {
  func.func @_matmul_bias_act_kernel(%arg0: i32, %arg1: i32, %arg2: i32, %arg3: memref<512x18xbf16, #tpu.memory_space<vmem>>, %arg4: memref<18x128xbf16, #tpu.memory_space<vmem>>, %arg5: memref<1x128xf32, #tpu.memory_space<vmem>>, %arg6: memref<512x128xf32, #tpu.memory_space<vmem>>, %arg7: memref<512x128xf32, #tpu.memory_space<vmem>>) attributes {dimension_semantics = [#tpu.dimension_semantics<parallel>, #tpu.dimension_semantics<parallel>, #tpu.dimension_semantics<arbitrary>], iteration_bounds = array<i64: 4, 1, 1>, scalar_prefetch = 0 : i64, scratch_operands = 1 : i64, tpu.core_type = #tpu.core_type<tc>, window_params = [{transform_indices = @transform_0, window_bounds = array<i64: 512, 18>}, {transform_indices = @transform_1, window_bounds = array<i64: 18, 128>}, {transform_indices = @transform_2, window_bounds = array<i64: 1, 128>}, {transform_indices = @transform_3, window_bounds = array<i64: 512, 128>}]} {
    %c0_i32 = arith.constant 0 : i32
    %0 = arith.cmpi eq, %arg2, %c0_i32 : i32
    %1 = arith.extui %0 : i1 to i32
    %c0_i32_0 = arith.constant 0 : i32
    %2 = arith.cmpi ne, %1, %c0_i32_0 : i32
    scf.if %2 {
      %cst_10 = arith.constant 0.000000e+00 : f32
      %12 = vector.broadcast %cst_10 : f32 to vector<512x128xf32>
      %c0_11 = arith.constant 0 : index
      %c0_12 = arith.constant 0 : index
      %13 = vector.load %arg7[%c0_11, %c0_12] : memref<512x128xf32, #tpu.memory_space<vmem>>, vector<512x128xf32>
      tpu.vector_store %arg7[%c0_11, %c0_12], %12 {strides = array<i32>} : memref<512x128xf32, #tpu.memory_space<vmem>>, vector<512x128xf32>,
    } else {
    }
    %c0 = arith.constant 0 : index
    %c0_1 = arith.constant 0 : index
    %3 = vector.load %arg7[%c0, %c0_1] : memref<512x128xf32, #tpu.memory_space<vmem>>, vector<512x128xf32>
    %c0_2 = arith.constant 0 : index
    %c0_3 = arith.constant 0 : index
    %4 = vector.load %arg3[%c0_2, %c0_3] : memref<512x18xbf16, #tpu.memory_space<vmem>>, vector<512x18xbf16>
    %c0_4 = arith.constant 0 : index
    %c0_5 = arith.constant 0 : index
    %5 = vector.load %arg4[%c0_4, %c0_5] : memref<18x128xbf16, #tpu.memory_space<vmem>>, vector<18x128xbf16>
    %cst = arith.constant dense<0.000000e+00> : vector<512x128xf32>
    %6 = tpu.matmul %4, %5, %cst {dimension_numbers = #tpu.dot_dimension_numbers<[1], [0], [0], [1], [0, 0, 1, 1], [], []>} : vector<512x18xbf16>, vector<18x128xbf16>, vector<512x128xf32> -> vector<512x128xf32>
    %7 = arith.addf %3, %6 : vector<512x128xf32>
    %c0_6 = arith.constant 0 : index
    %c0_7 = arith.constant 0 : index
    %8 = vector.load %arg7[%c0_6, %c0_7] : memref<512x128xf32, #tpu.memory_space<vmem>>, vector<512x128xf32>
    tpu.vector_store %arg7[%c0_6, %c0_7], %7 {strides = array<i32>} : memref<512x128xf32, #tpu.memory_space<vmem>>, vector<512x128xf32>,
    %c0_i32_8 = arith.constant 0 : i32
    %9 = arith.cmpi eq, %arg2, %c0_i32_8 : i32
    %10 = arith.extui %9 : i1 to i32
    %c0_i32_9 = arith.constant 0 : i32
    %11 = arith.cmpi ne, %10, %c0_i32_9 : i32
    scf.if %11 {
      %c0_10 = arith.constant 0 : index
      %c0_11 = arith.constant 0 : index
      %12 = vector.load %arg7[%c0_10, %c0_11] : memref<512x128xf32, #tpu.memory_space<vmem>>, vector<512x128xf32>
      %c0_12 = arith.constant 0 : index
      %c0_13 = arith.constant 0 : index
      %13 = vector.load %arg5[%c0_12, %c0_13] : memref<1x128xf32, #tpu.memory_space<vmem>>, vector<1x128xf32>
      %14 = vector.broadcast %13 : vector<1x128xf32> to vector<512x128xf32>
      %15 = arith.addf %12, %14 : vector<512x128xf32>
      %cst_14 = arith.constant 0.000000e+00 : f32
      %16 = vector.broadcast %cst_14 : f32 to vector<512x128xf32>
      %17 = arith.maximumf %15, %16 : vector<512x128xf32>
      %c0_15 = arith.constant 0 : index
      %c0_16 = arith.constant 0 : index
      %18 = vector.load %arg6[%c0_15, %c0_16] : memref<512x128xf32, #tpu.memory_space<vmem>>, vector<512x128xf32>
      tpu.vector_store %arg6[%c0_15, %c0_16], %17 {strides = array<i32>} : memref<512x128xf32, #tpu.memory_space<vmem>>, vector<512x128xf32>,
    } else {
    }
    return
  }
  func.func @transform_0(%arg0: i32, %arg1: i32, %arg2: i32) -> (i32, i32) {
    %c0_i32 = arith.constant 0 : i32
    return %arg0, %arg2 : i32, i32
  }
  func.func @transform_1(%arg0: i32, %arg1: i32, %arg2: i32) -> (i32, i32) {
    %c0_i32 = arith.constant 0 : i32
    return %arg2, %arg1 : i32, i32
  }
  func.func @transform_2(%arg0: i32, %arg1: i32, %arg2: i32) -> (i32, i32) {
    %c0_i32 = arith.constant 0 : i32
    %c0_i32_0 = arith.constant 0 : i32
    return %c0_i32, %arg1 : i32, i32
  }
  func.func @transform_3(%arg0: i32, %arg1: i32, %arg2: i32) -> (i32, i32) {
    %c0_i32 = arith.constant 0 : i32
    return %arg0, %arg1 : i32, i32
  }
}

</mosaic_0001>

<bundles_post_ra>
// kernel: tpu_custom_call.1
= control target key start
LH: loop header
LB: loop body
LE: loop exit
PB: predicated region body
PF: predicated region fallthrough
CT: control target
= control target key end

     0   :  { %8 = vsyncpa [#allocation4], 0  ;;  %s2235_s0 = inlined_call_operand.vmem [shape: bf16[2048,18], index: 0, kind: input, shape index: {}]   ;;  %s2236_s1 = inlined_call_operand.vmem [shape: bf16[18,128], index: 1, kind: input, shape index: {}]   ;;  %s2237_s2 = inlined_call_operand.vmem [shape: f32[1,128], index: 2, kind: input, shape index: {}]   ;;  %s2238_s3 = inlined_call_operand.hbm [shape: f32[2048,128], index: 3, kind: output, shape index: {}]  }
   0x1   :  { %10 = vsyncpa [#allocation4 + $0x1], 0  ;;  %s1910_s12 = smov 0   ;;  %s1912_s13 = smov 0  }
   0x2   :  { %s1914_s14 = smov 0   ;;  %s1916_s15 = smov 0  }
   0x3   :  { %s1918_s16 = smov 0   ;;  %s1920_s17 = smov 0  }
   0x4 LB: > { %s1527_s18 = sadd.s32 4294967295, %s1885_s17   ;;  %s1528_s19 = sadd.s32 4294967294, %s1885_s17   ;;  %s1885_s17 = sphi %s1920_s17, %s16_s17   ;;  %s1881_s16 = sphi %s1918_s16, %s2245_s16   ;;  %s1877_s15 = sphi %s1916_s15, %s2244_s15   ;;  %s1873_s14 = sphi %s1914_s14, %s2243_s14   ;;  %s1869_s13 = sphi %s1912_s13, %s2242_s13   ;;  %s1865_s12 = sphi %s1910_s12, %s2241_s12  }
   0x5   : > { %s35_s20 = sadd.s32 1, %s1881_s16  ;;  %s126_s21 = sadd.s32 1, %s1873_s14 }
   0x6   : > { %p37_p0 = scmp.ge.s32.totalorder %s35_s20, 4  ;;  %p136_p1 = scmp.ne.s32.totalorder %s1873_s14, %s1869_s13 }
   0x7   : > { %p137_p2 = scmp.eq.s32.totalorder %s1527_s18, 3  ;;  %p142_p3 = scmp.ne.s32.totalorder %s1869_s13, %s1865_s12 }
   0x8   : > { %s2247_s20 = smov (%p37_p0, %s35_s20), 0  ;;  %p143_p5 = scmp.eq.s32.totalorder %s1528_s19, 3 }
   0x9   : > { %p1950_p4 = por %p137_p2, %p136_p1  ;;  %s121_s23 = ssub.s32 %s1881_s16, %s2247_s20 }
   0xa   : > { %p1533_p6 = scmp.ge.s32.totalorder %s1885_s17, 1  ;;  %p124_p7 = scmp.eq.s32.totalorder %s121_s23, 0 }
   0xb   : > { %p1957_p8 = por %p143_p5, %p142_p3  ;;  %p191_p9 = scmp.lt.s32.totalorder %s1885_s17, 5 }
   0xc   : > { %s1963_s25 = scalar_select %p124_p7, %s1873_s14, %s126_s21  }
   0xd   : > { %p192_p10 = pnand %p1533_p6, %p191_p9 }
   0xe   : > { %s1535_s30 = sshll.u32 (!%p192_p10), %s1877_s15, 6  ;;  %s226_s8 = sand.u32 (!%p192_p10), 1, %s1869_s13  }
   0xf   : > { %195 = sbr.rel (%p192_p10) target bundleno = 302 (0x12e), region = 32  ;;  %p230_p11 = scmp.lt.s32.totalorder (!%p192_p10), %s1535_s30, 255 }
  0x10   : > { %s1534_s11 = sshll.u32 (!%p192_p10), %s226_s8, 9  ;;  %s1609_s19 = sshll.u32 (!%p192_p10), %s1877_s15, 13 }
  0x11   : > { %s2053_s18 = scalar_lea.vmem (!%p192_p10), [#allocation3], %s1534_s11  ;;  %s2181_s27 = scalar_lea.hbm (!%p192_p10), %s2238_s3, %s1609_s19 }
  0x12   : > { %s1419_s21 = sshll.u32 (!%p192_p10), %s2053_s18, 4  ;;  %s2190_s15 = scalar_lea.sflag (!%p192_p10), [#allocation4], %s226_s8  ;;  %s2183_s21 = int_to_ptr.vmem [resolvable:$true] %s1419_s21 }
  0x13   : > { %s1809_s28 = scalar_lea.vmem (!%p192_p10), %s2183_s21, 8192  ;;  %s1887_s29 = smov (!%p192_p10), [#allocation3]  }
  0x14   : > { %v1775_v0 = vld [vmem:[%s2236_s1 + $0x8] ss:$0 sps:$4 sm:$0x11]   ;;  %vm717_vm0 = vcmask 1040384   ;;  %v1776_v1 = vld [vmem:[%s2236_s1] sm:$0xff]   ;;  %s2249_s30 = smov (!%p230_p11, %s1535_s30), 255  ;;  %p1810_p12 = scmp.ne.s32.totalorder %s2183_s21, %s1809_s28 }
  0x15   : > { %1716 = vmatprep.subr.msk.bf16.mxu0 %vm717_vm0, %v1775_v0  ;;  %1717 = vmatprep.subr.msk.bf16.mxu1 %vm717_vm0, %v1775_v0  ;;  %v719_v2 = vsel %vm717_vm0, %v1775_v0, 0  ;;  %s1536_s4 = sshll.u32 %s2249_s30, 2  ;;  %vm620_vm1 = vcmask 146432   ;;  %v2045_v35 = vld [vmem:[%s2237_s2] ss:$0 sm:$0xff]  ;;  %s1813_s30 = sshll.u32 %s1887_s29, 4  ;;  %s1814_s30 = int_to_ptr.vmem [resolvable:$false] %s1813_s30 }
  0x16   : > { %1645 = vmatpush3.bf16.msra.mxu0 %v719_v2  ;;  %1714 = vmatpush3.bf16.msra.mxu1 %v719_v2  ;;  %s1975_s7 = scalar_lea.vmem %s2235_s0, %s1536_s4  ;;  %p1811_p13 = pnand %p1810_p12, %p1950_p4 }
  0x17   : > { %1646 = vmatprep.subr.bf16.mxu0 %v1776_v1  ;;  %1713 = vmatprep.subr.bf16.mxu1 %v1776_v1  ;;  %v1777_v3 = vld [vmem:[%s1975_s7] sm:$0xff]   ;;  %v1779_v5 = vld [vmem:[%s1975_s7 + $0x8] sm:$0xff]   ;;  %v1781_v7 = vld [vmem:[%s1975_s7 + $0x10] sm:$0xff]   ;;  %s1815_s4 = scalar_lea.vmem %s1814_s30, 16384  ;;  %p1816_p1 = scmp.lt.s32.totalorder %s2183_s21, %s1814_s30 }
  0x18   : > { %v1778_v4 = vld [vmem:[%s1975_s7 + $0x80] sm:$0xff]   ;;  %1648 = vmatprep.mubr.msk.bf16.mxu0 %vm620_vm1, %v1777_v3  ;;  %v1780_v6 = vld [vmem:[%s1975_s7 + $0x88] sm:$0xff]   ;;  %v1782_v8 = vld [vmem:[%s1975_s7 + $0x90] sm:$0xff]   ;;  %p1812_p0 = pneg %p1811_p13  ;;  %p1817_p2 = scmp.lt.s32.totalorder %s1815_s4, %s1809_s28 }
  0x19   : > { %1680 = vmatprep.mubr.msk.bf16.mxu1 %vm620_vm1, %v1778_v4  ;;  %v1783_v9 = vld [vmem:[%s1975_s7 + $0x18] sm:$0xff]   ;;  %v1785_v11 = vld [vmem:[%s1975_s7 + $0x20] sm:$0xff]   ;;  %v1787_v13 = vld [vmem:[%s1975_s7 + $0x28] sm:$0xff]  }
  0x1a   : > { %1647 = vmatpush3.bf16.msra.mxu0 %v1776_v1  ;;  %1715 = vmatpush3.bf16.msra.mxu1 %v1776_v1  ;;  %v1784_v10 = vld [vmem:[%s1975_s7 + $0x98] sm:$0xff]   ;;  %v1786_v12 = vld [vmem:[%s1975_s7 + $0xa0] sm:$0xff]   ;;  %v1788_v14 = vld [vmem:[%s1975_s7 + $0xa8] sm:$0xff]   ;;  %p1818_p3 = por %p1817_p2, %p1816_p1 }
  0x1b   : > { %v1789_v15 = vld [vmem:[%s1975_s7 + $0x30] sm:$0xff]   ;;  %v1791_v17 = vld [vmem:[%s1975_s7 + $0x38] sm:$0xff]   ;;  %v1793_v19 = vld [vmem:[%s1975_s7 + $0x40] sm:$0xff]  }
  0x1c   : > { %v1790_v16 = vld [vmem:[%s1975_s7 + $0xb0] sm:$0xff]   ;;  %v1792_v18 = vld [vmem:[%s1975_s7 + $0xb8] sm:$0xff]   ;;  %v1794_v20 = vld [vmem:[%s1975_s7 + $0xc0] sm:$0xff]   ;;  %p1819_p5 = pnand %p1818_p3, %p1812_p0 }
  0x1d   : > { %1649 = vmatmul.mubr.msk.bf16.vlgmr.msra.gmra.mxu0 %vm620_vm1, %v1779_v5  ;;  %1681 = vmatmul.mubr.msk.bf16.vlgmr.msra.gmra.mxu1 %vm620_vm1, %v1780_v6  ;;  %v1795_v21 = vld [vmem:[%s1975_s7 + $0x48] sm:$0xff]   ;;  %v1797_v23 = vld [vmem:[%s1975_s7 + $0x50] sm:$0xff]   ;;  %v1799_v25 = vld [vmem:[%s1975_s7 + $0x58] sm:$0xff]  }
  0x1e   : > { %1652 = vmatprep.mubr.msk.bf16.mxu0 %vm620_vm1, %v1781_v7  ;;  %1684 = vmatprep.mubr.msk.bf16.mxu1 %vm620_vm1, %v1782_v8  ;;  %v1796_v22 = vld [vmem:[%s1975_s7 + $0xc8] sm:$0xff]   ;;  %v1798_v24 = vld [vmem:[%s1975_s7 + $0xd0] sm:$0xff]   ;;  %v1800_v26 = vld [vmem:[%s1975_s7 + $0xd8] sm:$0xff]  }
  0x1f   : > { %v1801_v27 = vld [vmem:[%s1975_s7 + $0x60] sm:$0xff]   ;;  %v1803_v29 = vld [vmem:[%s1975_s7 + $0x68] sm:$0xff]   ;;  %v1805_v31 = vld [vmem:[%s1975_s7 + $0x70] sm:$0xff]  }
  0x20   : > { %v1802_v28 = vld [vmem:[%s1975_s7 + $0xe0] sm:$0xff]   ;;  %v1804_v30 = vld [vmem:[%s1975_s7 + $0xe8] sm:$0xff]   ;;  %v1806_v32 = vld [vmem:[%s1975_s7 + $0xf0] sm:$0xff]  }
  0x21   : > { %v1807_v33 = vld [vmem:[%s1975_s7 + $0x78] sm:$0xff]  }
  0x22   : > { %v1808_v34 = vld [vmem:[%s1975_s7 + $0xf8] sm:$0xff]  }
  0x25   : > { %1653 = vmatmul.mubr.msk.bf16.gmra.mxu0 %vm620_vm1, %v1783_v9  ;;  %1685 = vmatmul.mubr.msk.bf16.gmra.mxu1 %vm620_vm1, %v1784_v10 }
  0x26   : > { %1656 = vmatprep.mubr.msk.bf16.mxu0 %vm620_vm1, %v1785_v11  ;;  %1688 = vmatprep.mubr.msk.bf16.mxu1 %vm620_vm1, %v1786_v12 }
  0x2d   : > { %1657 = vmatmul.mubr.msk.bf16.gmra.mxu0 %vm620_vm1, %v1787_v13  ;;  %1689 = vmatmul.mubr.msk.bf16.gmra.mxu1 %vm620_vm1, %v1788_v14 }
  0x2e   : > { %1660 = vmatprep.mubr.msk.bf16.mxu0 %vm620_vm1, %v1789_v15  ;;  %1692 = vmatprep.mubr.msk.bf16.mxu1 %vm620_vm1, %v1790_v16 }
  0x35   : > { %1661 = vmatmul.mubr.msk.bf16.gmra.mxu0 %vm620_vm1, %v1791_v17  ;;  %1693 = vmatmul.mubr.msk.bf16.gmra.mxu1 %vm620_vm1, %v1792_v18 }
  0x36   : > { %1664 = vmatprep.mubr.msk.bf16.mxu0 %vm620_vm1, %v1793_v19  ;;  %1696 = vmatprep.mubr.msk.bf16.mxu1 %vm620_vm1, %v1794_v20 }
  0x3d   : > { %1665 = vmatmul.mubr.msk.bf16.gmra.mxu0 %vm620_vm1, %v1795_v21  ;;  %1697 = vmatmul.mubr.msk.bf16.gmra.mxu1 %vm620_vm1, %v1796_v22 }
  0x3e   : > { %1668 = vmatprep.mubr.msk.bf16.mxu0 %vm620_vm1, %v1797_v23  ;;  %1700 = vmatprep.mubr.msk.bf16.mxu1 %vm620_vm1, %v1798_v24 }
  0x45   : > { %1669 = vmatmul.mubr.msk.bf16.gmra.mxu0 %vm620_vm1, %v1799_v25  ;;  %1701 = vmatmul.mubr.msk.bf16.gmra.mxu1 %vm620_vm1, %v1800_v26 }
  0x46   : > { %1672 = vmatprep.mubr.msk.bf16.mxu0 %vm620_vm1, %v1801_v27  ;;  %1704 = vmatprep.mubr.msk.bf16.mxu1 %vm620_vm1, %v1802_v28 }
  0x4d   : > { %1673 = vmatmul.mubr.msk.bf16.gmra.mxu0 %vm620_vm1, %v1803_v29  ;;  %1705 = vmatmul.mubr.msk.bf16.gmra.mxu1 %vm620_vm1, %v1804_v30 }
  0x4e   : > { %1676 = vmatprep.mubr.msk.bf16.mxu0 %vm620_vm1, %v1805_v31  ;;  %1708 = vmatprep.mubr.msk.bf16.mxu1 %vm620_vm1, %v1806_v32 }
  0x55   : > { %1677 = vmatmul.mubr.msk.bf16.gmra.mxu0 %vm620_vm1, %v1807_v33  ;;  %1709 = vmatmul.mubr.msk.bf16.gmra.mxu1 %vm620_vm1, %v1808_v34 }
  0xdd   : > { %v1650_v36 = vpop.f32.mrf.mxu0  ;;  %v1682_v38 = vpop.f32.mrf.mxu1 }
  0xde   : > { %v1214_v37 = vadd.f32 %v1650_v36, %v2045_v35  ;;  %v1246_v39 = vadd.f32 %v1682_v38, %v2045_v35 }
  0xdf   : > { %v755_v40 = vpop.f32.mrf.mxu0  ;;  %v883_v43 = vpop.f32.mrf.mxu1 }
  0xe0   : > { %v1278_v41 = vmax.f32 %v1214_v37, 0.0  ;;  %v1212_v42 = vadd.f32 %v2045_v35, %v755_v40  ;;  %v1310_v44 = vmax.f32 %v1246_v39, 0.0  ;;  %v1244_v45 = vadd.f32 %v2045_v35, %v883_v43 }
  0xe1   : > { %v1651_v46 = vpop.f32.mrf.mxu0  ;;  %v1683_v49 = vpop.f32.mrf.mxu1 }
  0xe2   : > { %1342 = vst [vmem:[%s2053_s18 + $0x10] sm:$0xff] %v1278_v41  ;;  %v1276_v47 = vmax.f32 %v1212_v42, 0.0  ;;  %v1215_v48 = vadd.f32 %v1651_v46, %v2045_v35  ;;  %1374 = vst [vmem:[%s2053_s18 + $0x110] sm:$0xff] %v1310_v44  ;;  %v1308_v50 = vmax.f32 %v1244_v45, 0.0  ;;  %v1247_v51 = vadd.f32 %v1683_v49, %v2045_v35 }
  0xe3   : > { %v758_v52 = vpop.f32.mrf.mxu0  ;;  %v886_v55 = vpop.f32.mrf.mxu1 }
  0xe4   : > { %1340 = vst [vmem:[%s2053_s18] sm:$0xff] %v1276_v47  ;;  %v1279_v53 = vmax.f32 %v1215_v48, 0.0  ;;  %v1213_v54 = vadd.f32 %v2045_v35, %v758_v52  ;;  %1372 = vst [vmem:[%s2053_s18 + $0x100] sm:$0xff] %v1308_v50  ;;  %v1311_v56 = vmax.f32 %v1247_v51, 0.0  ;;  %v1245_v57 = vadd.f32 %v2045_v35, %v886_v55 }
  0xe5   : > { %v1654_v58 = vpop.f32.mrf.mxu0  ;;  %v1686_v61 = vpop.f32.mrf.mxu1 }
  0xe6   : > { %1343 = vst [vmem:[%s2053_s18 + $0x18] sm:$0xff] %v1279_v53  ;;  %v1277_v59 = vmax.f32 %v1213_v54, 0.0  ;;  %v1218_v60 = vadd.f32 %v1654_v58, %v2045_v35  ;;  %1375 = vst [vmem:[%s2053_s18 + $0x118] sm:$0xff] %v1311_v56  ;;  %v1309_v62 = vmax.f32 %v1245_v57, 0.0  ;;  %v1250_v63 = vadd.f32 %v1686_v61, %v2045_v35 }
  0xe7   : > { %v771_v0 = vpop.f32.mrf.mxu0  ;;  %v899_v3 = vpop.f32.mrf.mxu1 }
  0xe8   : > { %1341 = vst [vmem:[%s2053_s18 + $0x8] sm:$0xff] %v1277_v59  ;;  %v1282_v1 = vmax.f32 %v1218_v60, 0.0  ;;  %v1216_v2 = vadd.f32 %v2045_v35, %v771_v0  ;;  %1373 = vst [vmem:[%s2053_s18 + $0x108] sm:$0xff] %v1309_v62  ;;  %v1314_v4 = vmax.f32 %v1250_v63, 0.0  ;;  %v1248_v5 = vadd.f32 %v2045_v35, %v899_v3 }
  0xe9   : > { %v1655_v6 = vpop.f32.mrf.mxu0  ;;  %v1687_v9 = vpop.f32.mrf.mxu1 }
  0xea   : > { %1346 = vst [vmem:[%s2053_s18 + $0x30] sm:$0xff] %v1282_v1  ;;  %v1280_v7 = vmax.f32 %v1216_v2, 0.0  ;;  %v1219_v8 = vadd.f32 %v1655_v6, %v2045_v35  ;;  %1378 = vst [vmem:[%s2053_s18 + $0x130] sm:$0xff] %v1314_v4  ;;  %v1312_v10 = vmax.f32 %v1248_v5, 0.0  ;;  %v1251_v11 = vadd.f32 %v1687_v9, %v2045_v35 }
  0xeb   : > { %v774_v12 = vpop.f32.mrf.mxu0  ;;  %v902_v15 = vpop.f32.mrf.mxu1 }
  0xec   : > { %1344 = vst [vmem:[%s2053_s18 + $0x20] sm:$0xff] %v1280_v7  ;;  %v1283_v13 = vmax.f32 %v1219_v8, 0.0  ;;  %v1217_v14 = vadd.f32 %v2045_v35, %v774_v12  ;;  %1376 = vst [vmem:[%s2053_s18 + $0x120] sm:$0xff] %v1312_v10  ;;  %v1315_v16 = vmax.f32 %v1251_v11, 0.0  ;;  %v1249_v17 = vadd.f32 %v2045_v35, %v902_v15 }
  0xed   : > { %v1658_v18 = vpop.f32.mrf.mxu0  ;;  %v1690_v21 = vpop.f32.mrf.mxu1 }
  0xee   : > { %1347 = vst [vmem:[%s2053_s18 + $0x38] sm:$0xff] %v1283_v13  ;;  %v1281_v19 = vmax.f32 %v1217_v14, 0.0  ;;  %v1222_v20 = vadd.f32 %v1658_v18, %v2045_v35  ;;  %1379 = vst [vmem:[%s2053_s18 + $0x138] sm:$0xff] %v1315_v16  ;;  %v1313_v22 = vmax.f32 %v1249_v17, 0.0  ;;  %v1254_v23 = vadd.f32 %v1690_v21, %v2045_v35 }
  0xef   : > { %v787_v24 = vpop.f32.mrf.mxu0  ;;  %v915_v27 = vpop.f32.mrf.mxu1 }
  0xf0   : > { %1345 = vst [vmem:[%s2053_s18 + $0x28] sm:$0xff] %v1281_v19  ;;  %v1286_v25 = vmax.f32 %v1222_v20, 0.0  ;;  %v1220_v26 = vadd.f32 %v2045_v35, %v787_v24  ;;  %1377 = vst [vmem:[%s2053_s18 + $0x128] sm:$0xff] %v1313_v22  ;;  %v1318_v28 = vmax.f32 %v1254_v23, 0.0  ;;  %v1252_v29 = vadd.f32 %v2045_v35, %v915_v27 }
  0xf1   : > { %v1659_v30 = vpop.f32.mrf.mxu0  ;;  %v1691_v33 = vpop.f32.mrf.mxu1 }
  0xf2   : > { %1350 = vst [vmem:[%s2053_s18 + $0x50] sm:$0xff] %v1286_v25  ;;  %v1284_v31 = vmax.f32 %v1220_v26, 0.0  ;;  %v1223_v32 = vadd.f32 %v1659_v30, %v2045_v35  ;;  %1382 = vst [vmem:[%s2053_s18 + $0x150] sm:$0xff] %v1318_v28  ;;  %v1316_v34 = vmax.f32 %v1252_v29, 0.0  ;;  %v1255_v36 = vadd.f32 %v1691_v33, %v2045_v35 }
  0xf3   : > { %v790_v37 = vpop.f32.mrf.mxu0  ;;  %v918_v40 = vpop.f32.mrf.mxu1 }
  0xf4   : > { %1348 = vst [vmem:[%s2053_s18 + $0x40] sm:$0xff] %v1284_v31  ;;  %v1287_v38 = vmax.f32 %v1223_v32, 0.0  ;;  %v1221_v39 = vadd.f32 %v2045_v35, %v790_v37  ;;  %1380 = vst [vmem:[%s2053_s18 + $0x140] sm:$0xff] %v1316_v34  ;;  %v1319_v41 = vmax.f32 %v1255_v36, 0.0  ;;  %v1253_v42 = vadd.f32 %v2045_v35, %v918_v40 }
  0xf5   : > { %v1662_v43 = vpop.f32.mrf.mxu0  ;;  %v1694_v46 = vpop.f32.mrf.mxu1 }
  0xf6   : > { %1351 = vst [vmem:[%s2053_s18 + $0x58] sm:$0xff] %v1287_v38  ;;  %v1285_v44 = vmax.f32 %v1221_v39, 0.0  ;;  %v1226_v45 = vadd.f32 %v1662_v43, %v2045_v35  ;;  %1383 = vst [vmem:[%s2053_s18 + $0x158] sm:$0xff] %v1319_v41  ;;  %v1317_v47 = vmax.f32 %v1253_v42, 0.0  ;;  %v1258_v48 = vadd.f32 %v1694_v46, %v2045_v35 }
  0xf7   : > { %v803_v49 = vpop.f32.mrf.mxu0  ;;  %v931_v52 = vpop.f32.mrf.mxu1 }
  0xf8   : > { %1349 = vst [vmem:[%s2053_s18 + $0x48] sm:$0xff] %v1285_v44  ;;  %v1290_v50 = vmax.f32 %v1226_v45, 0.0  ;;  %v1224_v51 = vadd.f32 %v2045_v35, %v803_v49  ;;  %1381 = vst [vmem:[%s2053_s18 + $0x148] sm:$0xff] %v1317_v47  ;;  %v1322_v53 = vmax.f32 %v1258_v48, 0.0  ;;  %v1256_v54 = vadd.f32 %v2045_v35, %v931_v52 }
  0xf9   : > { %v1663_v55 = vpop.f32.mrf.mxu0  ;;  %v1695_v58 = vpop.f32.mrf.mxu1 }
  0xfa   : > { %1354 = vst [vmem:[%s2053_s18 + $0x70] sm:$0xff] %v1290_v50  ;;  %v1288_v56 = vmax.f32 %v1224_v51, 0.0  ;;  %v1227_v57 = vadd.f32 %v1663_v55, %v2045_v35  ;;  %1386 = vst [vmem:[%s2053_s18 + $0x170] sm:$0xff] %v1322_v53  ;;  %v1320_v59 = vmax.f32 %v1256_v54, 0.0  ;;  %v1259_v60 = vadd.f32 %v1695_v58, %v2045_v35 }
  0xfb   : > { %v806_v61 = vpop.f32.mrf.mxu0  ;;  %v934_v0 = vpop.f32.mrf.mxu1 }
  0xfc   : > { %1352 = vst [vmem:[%s2053_s18 + $0x60] sm:$0xff] %v1288_v56  ;;  %v1291_v62 = vmax.f32 %v1227_v57, 0.0  ;;  %v1225_v63 = vadd.f32 %v2045_v35, %v806_v61  ;;  %1384 = vst [vmem:[%s2053_s18 + $0x160] sm:$0xff] %v1320_v59  ;;  %v1323_v1 = vmax.f32 %v1259_v60, 0.0  ;;  %v1257_v2 = vadd.f32 %v2045_v35, %v934_v0 }
  0xfd   : > { %v1666_v3 = vpop.f32.mrf.mxu0  ;;  %v1698_v6 = vpop.f32.mrf.mxu1 }
  0xfe   : > { %1355 = vst [vmem:[%s2053_s18 + $0x78] sm:$0xff] %v1291_v62  ;;  %v1289_v4 = vmax.f32 %v1225_v63, 0.0  ;;  %v1230_v5 = vadd.f32 %v1666_v3, %v2045_v35  ;;  %1387 = vst [vmem:[%s2053_s18 + $0x178] sm:$0xff] %v1323_v1  ;;  %v1321_v7 = vmax.f32 %v1257_v2, 0.0  ;;  %v1262_v8 = vadd.f32 %v1698_v6, %v2045_v35 }
  0xff   : > { %v819_v9 = vpop.f32.mrf.mxu0  ;;  %v947_v12 = vpop.f32.mrf.mxu1 }
 0x100   : > { %1353 = vst [vmem:[%s2053_s18 + $0x68] sm:$0xff] %v1289_v4  ;;  %v1294_v10 = vmax.f32 %v1230_v5, 0.0  ;;  %v1228_v11 = vadd.f32 %v2045_v35, %v819_v9  ;;  %1385 = vst [vmem:[%s2053_s18 + $0x168] sm:$0xff] %v1321_v7  ;;  %v1326_v13 = vmax.f32 %v1262_v8, 0.0  ;;  %v1260_v14 = vadd.f32 %v2045_v35, %v947_v12 }
 0x101   : > { %v1667_v15 = vpop.f32.mrf.mxu0  ;;  %v1699_v18 = vpop.f32.mrf.mxu1 }
 0x102   : > { %1358 = vst [vmem:[%s2053_s18 + $0x90] sm:$0xff] %v1294_v10  ;;  %v1292_v16 = vmax.f32 %v1228_v11, 0.0  ;;  %v1231_v17 = vadd.f32 %v1667_v15, %v2045_v35  ;;  %1390 = vst [vmem:[%s2053_s18 + $0x190] sm:$0xff] %v1326_v13  ;;  %v1324_v19 = vmax.f32 %v1260_v14, 0.0  ;;  %v1263_v20 = vadd.f32 %v1699_v18, %v2045_v35 }
 0x103   : > { %v822_v21 = vpop.f32.mrf.mxu0  ;;  %v950_v24 = vpop.f32.mrf.mxu1 }
 0x104   : > { %1356 = vst [vmem:[%s2053_s18 + $0x80] sm:$0xff] %v1292_v16  ;;  %v1295_v22 = vmax.f32 %v1231_v17, 0.0  ;;  %v1229_v23 = vadd.f32 %v2045_v35, %v822_v21  ;;  %1388 = vst [vmem:[%s2053_s18 + $0x180] sm:$0xff] %v1324_v19  ;;  %v1327_v25 = vmax.f32 %v1263_v20, 0.0  ;;  %v1261_v26 = vadd.f32 %v2045_v35, %v950_v24 }
 0x105   : > { %v1670_v27 = vpop.f32.mrf.mxu0  ;;  %v1702_v30 = vpop.f32.mrf.mxu1 }
 0x106   : > { %1359 = vst [vmem:[%s2053_s18 + $0x98] sm:$0xff] %v1295_v22  ;;  %v1293_v28 = vmax.f32 %v1229_v23, 0.0  ;;  %v1234_v29 = vadd.f32 %v1670_v27, %v2045_v35  ;;  %1391 = vst [vmem:[%s2053_s18 + $0x198] sm:$0xff] %v1327_v25  ;;  %v1325_v31 = vmax.f32 %v1261_v26, 0.0  ;;  %v1266_v32 = vadd.f32 %v1702_v30, %v2045_v35 }
 0x107   : > { %v835_v33 = vpop.f32.mrf.mxu0  ;;  %v963_v37 = vpop.f32.mrf.mxu1 }
 0x108   : > { %1357 = vst [vmem:[%s2053_s18 + $0x88] sm:$0xff] %v1293_v28  ;;  %v1298_v34 = vmax.f32 %v1234_v29, 0.0  ;;  %v1232_v36 = vadd.f32 %v2045_v35, %v835_v33  ;;  %1389 = vst [vmem:[%s2053_s18 + $0x188] sm:$0xff] %v1325_v31  ;;  %v1330_v38 = vmax.f32 %v1266_v32, 0.0  ;;  %v1264_v39 = vadd.f32 %v2045_v35, %v963_v37 }
 0x109   : > { %v1671_v40 = vpop.f32.mrf.mxu0  ;;  %v1703_v43 = vpop.f32.mrf.mxu1 }
 0x10a   : > { %1362 = vst [vmem:[%s2053_s18 + $0xb0] sm:$0xff] %v1298_v34  ;;  %v1296_v41 = vmax.f32 %v1232_v36, 0.0  ;;  %v1235_v42 = vadd.f32 %v1671_v40, %v2045_v35  ;;  %1394 = vst [vmem:[%s2053_s18 + $0x1b0] sm:$0xff] %v1330_v38  ;;  %v1328_v44 = vmax.f32 %v1264_v39, 0.0  ;;  %v1267_v45 = vadd.f32 %v1703_v43, %v2045_v35 }
 0x10b   : > { %v838_v46 = vpop.f32.mrf.mxu0  ;;  %v966_v49 = vpop.f32.mrf.mxu1 }
 0x10c   : > { %1360 = vst [vmem:[%s2053_s18 + $0xa0] sm:$0xff] %v1296_v41  ;;  %v1299_v47 = vmax.f32 %v1235_v42, 0.0  ;;  %v1233_v48 = vadd.f32 %v2045_v35, %v838_v46  ;;  %1392 = vst [vmem:[%s2053_s18 + $0x1a0] sm:$0xff] %v1328_v44  ;;  %v1331_v50 = vmax.f32 %v1267_v45, 0.0  ;;  %v1265_v51 = vadd.f32 %v2045_v35, %v966_v49 }
 0x10d   : > { %v1674_v52 = vpop.f32.mrf.mxu0  ;;  %v1706_v55 = vpop.f32.mrf.mxu1 }
 0x10e   : > { %1363 = vst [vmem:[%s2053_s18 + $0xb8] sm:$0xff] %v1299_v47  ;;  %v1297_v53 = vmax.f32 %v1233_v48, 0.0  ;;  %v1238_v54 = vadd.f32 %v1674_v52, %v2045_v35  ;;  %1395 = vst [vmem:[%s2053_s18 + $0x1b8] sm:$0xff] %v1331_v50  ;;  %v1329_v56 = vmax.f32 %v1265_v51, 0.0  ;;  %v1270_v57 = vadd.f32 %v1706_v55, %v2045_v35 }
 0x10f   : > { %v851_v58 = vpop.f32.mrf.mxu0  ;;  %v979_v61 = vpop.f32.mrf.mxu1 }
 0x110   : > { %1361 = vst [vmem:[%s2053_s18 + $0xa8] sm:$0xff] %v1297_v53  ;;  %v1302_v59 = vmax.f32 %v1238_v54, 0.0  ;;  %v1236_v60 = vadd.f32 %v2045_v35, %v851_v58  ;;  %1393 = vst [vmem:[%s2053_s18 + $0x1a8] sm:$0xff] %v1329_v56  ;;  %v1334_v62 = vmax.f32 %v1270_v57, 0.0  ;;  %v1268_v63 = vadd.f32 %v2045_v35, %v979_v61 }
 0x111   : > { %v1675_v0 = vpop.f32.mrf.mxu0  ;;  %v1707_v3 = vpop.f32.mrf.mxu1 }
 0x112   : > { %1366 = vst [vmem:[%s2053_s18 + $0xd0] sm:$0xff] %v1302_v59  ;;  %v1300_v1 = vmax.f32 %v1236_v60, 0.0  ;;  %v1239_v2 = vadd.f32 %v1675_v0, %v2045_v35  ;;  %1398 = vst [vmem:[%s2053_s18 + $0x1d0] sm:$0xff] %v1334_v62  ;;  %v1332_v4 = vmax.f32 %v1268_v63, 0.0  ;;  %v1271_v5 = vadd.f32 %v1707_v3, %v2045_v35 }
 0x113   : > { %v854_v6 = vpop.f32.mrf.mxu0  ;;  %v982_v9 = vpop.f32.mrf.mxu1 }
 0x114   : > { %1364 = vst [vmem:[%s2053_s18 + $0xc0] sm:$0xff] %v1300_v1  ;;  %v1303_v7 = vmax.f32 %v1239_v2, 0.0  ;;  %v1237_v8 = vadd.f32 %v2045_v35, %v854_v6  ;;  %1396 = vst [vmem:[%s2053_s18 + $0x1c0] sm:$0xff] %v1332_v4  ;;  %v1335_v10 = vmax.f32 %v1271_v5, 0.0  ;;  %v1269_v11 = vadd.f32 %v2045_v35, %v982_v9 }
 0x115   : > { %v1678_v12 = vpop.f32.mrf.mxu0  ;;  %v1710_v15 = vpop.f32.mrf.mxu1 }
 0x116   : > { %1367 = vst [vmem:[%s2053_s18 + $0xd8] sm:$0xff] %v1303_v7  ;;  %v1301_v13 = vmax.f32 %v1237_v8, 0.0  ;;  %v1242_v14 = vadd.f32 %v1678_v12, %v2045_v35  ;;  %1399 = vst [vmem:[%s2053_s18 + $0x1d8] sm:$0xff] %v1335_v10  ;;  %v1333_v16 = vmax.f32 %v1269_v11, 0.0  ;;  %v1274_v17 = vadd.f32 %v1710_v15, %v2045_v35 }
 0x117   : > { %v867_v18 = vpop.f32.mrf.mxu0  ;;  %v995_v21 = vpop.f32.mrf.mxu1 }
 0x118   : > { %1365 = vst [vmem:[%s2053_s18 + $0xc8] sm:$0xff] %v1301_v13  ;;  %v1306_v19 = vmax.f32 %v1242_v14, 0.0  ;;  %v1240_v20 = vadd.f32 %v2045_v35, %v867_v18  ;;  %1397 = vst [vmem:[%s2053_s18 + $0x1c8] sm:$0xff] %v1333_v16  ;;  %v1338_v22 = vmax.f32 %v1274_v17, 0.0  ;;  %v1272_v23 = vadd.f32 %v2045_v35, %v995_v21 }
 0x119   : > { %v1679_v24 = vpop.f32.mrf.mxu0  ;;  %v1711_v27 = vpop.f32.mrf.mxu1 }
 0x11a   : > { %1370 = vst [vmem:[%s2053_s18 + $0xf0] sm:$0xff] %v1306_v19  ;;  %v1304_v25 = vmax.f32 %v1240_v20, 0.0  ;;  %v1243_v26 = vadd.f32 %v1679_v24, %v2045_v35  ;;  %1402 = vst [vmem:[%s2053_s18 + $0x1f0] sm:$0xff] %v1338_v22  ;;  %v1336_v28 = vmax.f32 %v1272_v23, 0.0  ;;  %v1275_v29 = vadd.f32 %v1711_v27, %v2045_v35 }
 0x11b   : > { %v870_v30 = vpop.f32.mrf.mxu0  ;;  %v998_v33 = vpop.f32.mrf.mxu1 }
 0x11c   : > { %1368 = vst [vmem:[%s2053_s18 + $0xe0] sm:$0xff] %v1304_v25  ;;  %v1307_v31 = vmax.f32 %v1243_v26, 0.0  ;;  %v1241_v32 = vadd.f32 %v2045_v35, %v870_v30  ;;  %1400 = vst [vmem:[%s2053_s18 + $0x1e0] sm:$0xff] %v1336_v28  ;;  %v1339_v34 = vmax.f32 %v1275_v29, 0.0  ;;  %v1273_v36 = vadd.f32 %v2045_v35, %v998_v33 }
 0x11e   : > { %1371 = vst [vmem:[%s2053_s18 + $0xf8] sm:$0xff] %v1307_v31  ;;  %v1305_v37 = vmax.f32 %v1241_v32, 0.0  ;;  %1403 = vst [vmem:[%s2053_s18 + $0x1f8] sm:$0xff] %v1339_v34  ;;  %v1337_v38 = vmax.f32 %v1273_v36, 0.0 }
 0x120   : > { %1369 = vst [vmem:[%s2053_s18 + $0xe8] sm:$0xff] %v1305_v37  ;;  %1401 = vst [vmem:[%s2053_s18 + $0x1e8] sm:$0xff] %v1337_v38 }
 0x121   : > { %1822 = shalt.err (!%p1819_p5)
}
 0x122   : > { %s1823_s5 = scalar_lea.hbm %s2181_s27, 8192  ;;  %s1827_s8 = scalar_lea.hbm %s2238_s3, 32768 }
 0x123   : > { %p1824_p6 = scmp.ne.s32.totalorder %s2181_s27, %s1823_s5  ;;  %p1828_p10 = scmp.lt.s32.totalorder %s2181_s27, %s2238_s3 }
 0x124   : > { %p1829_p11 = scmp.lt.s32.totalorder %s1827_s8, %s1823_s5 }
 0x125   : > { %p1825_p7 = pnand %p1824_p6, %p1950_p4 }
 0x126   : > { %p1830_p12 = por %p1829_p11, %p1828_p10 }
 0x127   : > { %p1826_p9 = pneg %p1825_p7 }
 0x129   : > { %p1831_p13 = pnand %p1830_p12, %p1826_p9 }
 0x12b   : > { %1834 = shalt.err (!%p1831_p13)
}
 0x12c   : > { %s1888_s11 = smov 128   ;;  %s1889_s18 = smov 8  }
 0x12d   : > { %1718 = dma.vmem_to_hbm [thread:$0]  (%p1950_p4), %s2183_s21, 8192, %s2181_s27, %s2190_s15, %s1888_s11, %s1888_s11, %s1889_s18  }
 0x12e PF: > { %p1724_p0 = scmp.ge.s32.totalorder %s1885_s17, 2  ;;  %s1434_s19 = sand.u32 1, %s1865_s12  }
 0x12f   : > { %s1435_s23 = scalar_lea.sflag [#allocation4], %s1434_s19 }
 0x130   : > { %p1721_p1 = pnand %p1724_p0, %p1957_p8 }
 0x132   : > { %p1722_p2 = pneg %p1721_p1 }
 0x134   : > { %1860 = dma.done.wait (%p1722_p2), %s1435_s23, 8192  }
 0x135   : > { %1862 = vsyncadd (%p1722_p2), %s1435_s23, 4294959104  ;;  %s16_s17 = sadd.s32 1, %s1885_s17   ;;  %s2241_s12 = smov %s1869_s13 }
 0x136   : > { %p13_p3 = scmp.ge.s32.totalorder %s16_s17, 6   ;;  %s2242_s13 = smov %s1873_s14 }
 0x137   : > { %s2243_s14 = smov %s1963_s25  ;;  %s2244_s15 = smov %s1881_s16 }
 0x138   : > { %s2245_s16 = smov %s2247_s20  ;;  %15 = sbr.rel (!%p13_p3) target bundleno = 4 (0x4), region = 81 }
 0x13d   :  { %1440 = vsyncpa [#allocation4], 1 }
 0x13e   :  { %1442 = vsyncpa [#allocation4 + $0x1], 1 }

</bundles_post_ra>
